<compile_context>
chip_gen: v6e
topology: v6e:2x2x1
jax: 0.10.0
libtpu: 0.0.40
codegen_flags: <defaults>
</compile_context>

<pallas_src>
import functools

import jax
import jax.numpy as jnp
from jax.experimental import pallas as pl
from jax.experimental.pallas import tpu as pltpu

ALPHA = 1.0
GAMMA = 2          # module default; implemented as an explicit square (no pow)
_LANES = 128
_SUBLANES = 8
_F32_TEMPS = 4     # xm slab, exp(xm) slab, one-hot select slab, col iota (conservative)


def _vmem_capacity_bytes(default=64 << 20):
    """Physical VMEM per TensorCore; conservative v7x default if the query fails."""
    try:
        cap = int(getattr(pltpu.get_tpu_info(), "vmem_capacity_bytes"))
        if cap > 0:
            return cap
    except Exception:
        pass
    return default


def _choose_tile_n(n, c, itemsize):
    """Largest row-tile whose *total* VMEM footprint (double-buffered logits +
    lane-padded targets + f32 temporaries) stays within ~70% of physical VMEM,
    while keeping >= 4 grid steps when N is large enough."""
    budget = int(0.7 * _vmem_capacity_bytes())   # ~44 MiB on v7x, ~89 MiB on v5e/v6e
    per_row = (2 * c * itemsize            # double-buffered logits block
               + 2 * _LANES * 4            # double-buffered (tile_n, 1) i32 -> 128-lane padded
               + _F32_TEMPS * c * 4)       # in-kernel full-tile f32 temporaries
    rows = budget // max(1, per_row)
    # keep at least 4 grid steps when N allows it (v7x megacore + pipeline overlap)
    cap4 = max(_SUBLANES, (pl.cdiv(n, 4) // _SUBLANES) * _SUBLANES)
    rows = min(rows, 2048, cap4, pl.cdiv(max(n, 1), _SUBLANES) * _SUBLANES)
    rows = max(_SUBLANES, (rows // _SUBLANES) * _SUBLANES)
    # TODO(synk): very large C (even an 8-row block over budget) needs an online
    # logsumexp over a second grid axis; here we just clamp to the minimum tile.
    return rows


def _focal_loss_kernel(logits_ref, targets_ref, out_ref, *, n_valid, tile_n):
    """One grid step: focal-loss partial sum for rows [i*tile_n, (i+1)*tile_n)."""
    i = pl.program_id(0)

    x = logits_ref[...]                                  # (tile_n, C), native dtype
    t = targets_ref[...]                                 # (tile_n, 1) int32

    # Row max in the input dtype (max is exact in any dtype), then a single
    # fused upcast+subtract producing the only full-tile f32 slab (xm <= 0).
    m = jnp.max(x, axis=-1, keepdims=True)               # (tile_n, 1)
    xm = x.astype(jnp.float32) - m.astype(jnp.float32)   # (tile_n, C) f32

    # Stable cross-entropy: ce = log(sum exp(xm)) - xm[target]  (the +m cancels)
    sumexp = jnp.sum(jnp.exp(xm), axis=-1, keepdims=True)
    col = jax.lax.broadcasted_iota(jnp.int32, xm.shape, 1)
    tgt = jnp.sum(jnp.where(col == t, xm, 0.0), axis=-1, keepdims=True)
    ce = jnp.log(sumexp) - tgt                           # (tile_n, 1)

    # Focal modulation: alpha * (1 - pt)^2 * ce  (gamma == 2 -> explicit square)
    pt = jnp.exp(-ce)
    w = 1.0 - pt
    focal = ALPHA * (w * w) * ce                         # (tile_n, 1)

    # Mask rows of the ragged edge block (garbage rows -> 0; select does not
    # propagate NaN/inf from the unselected branch).
    row = jax.lax.broadcasted_iota(jnp.int32, (tile_n, 1), 0) + i * tile_n
    focal = jnp.where(row < n_valid, focal, 0.0)

    # Per-tile partial sum, written to a lane-dense (1, 8, 128) output tile.
    partial = jnp.sum(focal, axis=0, keepdims=True)      # (1, 1)
    sub = jax.lax.broadcasted_iota(jnp.int32, (1, _SUBLANES, _LANES), 1)
    lane = jax.lax.broadcasted_iota(jnp.int32, (1, _SUBLANES, _LANES), 2)
    out_ref[...] = jnp.where((sub == 0) & (lane == 0), partial, 0.0)


def focal_loss(logits, targets, *, tile_n=None):
    """Focal loss (alpha=1, gamma=2, reduction='mean').

    logits: (N, C) float array (f32 or bf16), targets: (N,) int class indices.
    """
    # TODO(synk): reduction='none'/'sum' variants are not exposed; the module's
    # default config (alpha=1, gamma=2, reduction='mean') is implemented.
    # TODO(synk): for C << 128 the (tile_n, C) block lane-pads to 128 and wastes
    # bandwidth; folding rows into the lane axis is not implemented here.
    n, c = logits.shape
    itemsize = jnp.dtype(logits.dtype).itemsize
    if tile_n is None:
        tile_n = _choose_tile_n(n, c, itemsize)
    tile_n = max(_SUBLANES, (int(tile_n) // _SUBLANES) * _SUBLANES)
    num_tiles = pl.cdiv(n, tile_n)

    targets2d = targets.astype(jnp.int32).reshape(n, 1)

    kernel = functools.partial(_focal_loss_kernel, n_valid=n, tile_n=tile_n)

    # Explicit scoped-VMEM limit sized from the actual footprint (+ headroom),
    # capped below physical VMEM for the current generation.
    logits_blk = tile_n * c * itemsize
    targets_blk = tile_n * _LANES * 4            # (tile_n, 1) i32 lane-pads to 128
    f32_blk = tile_n * c * 4
    needed = (2 * logits_blk + 2 * targets_blk + _F32_TEMPS * f32_blk
              + 2 * _SUBLANES * _LANES * 4)
    vmem_limit = int(min(needed + (8 << 20), int(0.95 * _vmem_capacity_bytes())))
    vmem_limit = max(vmem_limit, 16 << 20)

    cost = pl.CostEstimate(
        flops=6 * n * c + 8 * n,
        transcendentals=n * c + 2 * n,           # exp over logits, exp(-ce), log
        bytes_accessed=n * c * itemsize + n * 4 + num_tiles * _SUBLANES * _LANES * 4,
    )

    partials = pl.pallas_call(
        kernel,
        out_shape=jax.ShapeDtypeStruct((num_tiles, _SUBLANES, _LANES), jnp.float32),
        grid_spec=pltpu.PrefetchScalarGridSpec(
            num_scalar_prefetch=0,
            grid=(num_tiles,),
            in_specs=[
                pl.BlockSpec((tile_n, c), lambda i: (i, 0)),
                pl.BlockSpec((tile_n, 1), lambda i: (i, 0)),
            ],
            out_specs=pl.BlockSpec((1, _SUBLANES, _LANES), lambda i: (i, 0, 0)),
        ),
        compiler_params=pltpu.CompilerParams(
            dimension_semantics=("parallel",),
            vmem_limit_bytes=vmem_limit,
        ),
        cost_estimate=cost,
    )(logits, targets2d)

    # reduction='mean' over the true (unpadded) batch size
    return jnp.sum(partials) / n


def focal_loss_ref(logits, targets):
    # pure-JAX reference for sanity checking
    logp = jax.nn.log_softmax(logits.astype(jnp.float32), axis=-1)
    ce = -jnp.take_along_axis(logp, targets[:, None], axis=-1)[:, 0]
    pt = jnp.exp(-ce)
    return jnp.mean(ALPHA * (1.0 - pt) ** 2 * ce)


if __name__ == "__main__":
    key = jax.random.PRNGKey(0)
    k1, k2 = jax.random.split(key)
    N, C = 200, 128  # small; multi-tile grid with a ragged last tile (no HBM pad)
    logits = jax.random.normal(k1, (N, C), dtype=jnp.float32)
    targets = jax.random.randint(k2, (N,), 0, C, dtype=jnp.int32)
    ref = focal_loss_ref(logits, targets)

    # f32 path, explicit tile (200 % 64 != 0 -> ragged edge block, masked in-kernel)
    out = focal_loss(logits, targets, tile_n=64)
    jax.block_until_ready(out)
    assert jnp.allclose(out, ref, rtol=1e-5, atol=1e-6), (out, ref)

    # f32 path, auto-sized tile (>= 4 grid steps when N allows it)
    out_auto = focal_loss(logits, targets)
    jax.block_until_ready(out_auto)
    assert jnp.allclose(out_auto, ref, rtol=1e-5, atol=1e-6), (out_auto, ref)

    # bf16 input path (half the HBM bytes); in-kernel math stays f32
    logits_bf16 = logits.astype(jnp.bfloat16)
    out_bf = focal_loss(logits_bf16, targets)
    jax.block_until_ready(out_bf)
    ref_bf = focal_loss_ref(logits_bf16.astype(jnp.float32), targets)
    assert jnp.allclose(out_bf, ref_bf, rtol=1e-4, atol=1e-5), (out_bf, ref_bf)

    print("KERNEL_OK")
</pallas_src>

<mosaic_0001>
module attributes {stable_mosaic.version = 11 : i64} {
  func.func @_focal_loss_kernel(%arg0: i32, %arg1: memref<64x128xf32, #tpu.memory_space<vmem>>, %arg2: memref<64x1xi32, #tpu.memory_space<vmem>>, %arg3: memref<1x8x128xf32, #tpu.memory_space<vmem>>) attributes {dimension_semantics = [#tpu.dimension_semantics<parallel>], iteration_bounds = array<i64: 4>, scalar_prefetch = 0 : i64, scratch_operands = 0 : i64, tpu.core_type = #tpu.core_type<tc>, window_params = [{transform_indices = @transform_0, window_bounds = array<i64: 64, 128>}, {transform_indices = @transform_1, window_bounds = array<i64: 64, 1>}, {transform_indices = @transform_2, window_bounds = array<i64: 1, 8, 128>}]} {
    %c0 = arith.constant 0 : index
    %c0_0 = arith.constant 0 : index
    %0 = vector.load %arg1[%c0, %c0_0] : memref<64x128xf32, #tpu.memory_space<vmem>>, vector<64x128xf32>
    %c0_1 = arith.constant 0 : index
    %c0_2 = arith.constant 0 : index
    %1 = vector.load %arg2[%c0_1, %c0_2] : memref<64x1xi32, #tpu.memory_space<vmem>>, vector<64x1xi32>
    %cst = arith.constant dense<0xFF800000> : vector<64xf32>
    %2 = vector.multi_reduction <maximumf>, %0, %cst [1] : vector<64x128xf32> to vector<64xf32>
    %3 = vector.shape_cast %2 : vector<64xf32> to vector<64x1xf32>
    %4 = vector.broadcast %3 : vector<64x1xf32> to vector<64x128xf32>
    %5 = arith.subf %0, %4 : vector<64x128xf32>
    %6 = math.exp %5 : vector<64x128xf32>
    %cst_3 = arith.constant dense<0.000000e+00> : vector<64xf32>
    %7 = vector.multi_reduction <add>, %6, %cst_3 [1] : vector<64x128xf32> to vector<64xf32>
    %8 = vector.shape_cast %7 : vector<64xf32> to vector<64x1xf32>
    %9 = tpu.iota {dimensions = array<i32: 1>} : vector<64x128xi32>
    %10 = vector.broadcast %1 : vector<64x1xi32> to vector<64x128xi32>
    %11 = arith.cmpi eq, %9, %10 : vector<64x128xi32>
    %cst_4 = arith.constant 0.000000e+00 : f32
    %12 = vector.broadcast %cst_4 : f32 to vector<64x128xf32>
    %13 = arith.select %11, %5, %12 : vector<64x128xi1>, vector<64x128xf32>
    %cst_5 = arith.constant dense<0.000000e+00> : vector<64xf32>
    %14 = vector.multi_reduction <add>, %13, %cst_5 [1] : vector<64x128xf32> to vector<64xf32>
    %15 = vector.shape_cast %14 : vector<64xf32> to vector<64x1xf32>
    %16 = math.log %8 : vector<64x1xf32>
    %17 = arith.subf %16, %15 : vector<64x1xf32>
    %cst_6 = arith.constant 0.000000e+00 : f32
    %18 = vector.broadcast %cst_6 : f32 to vector<64x1xf32>
    %19 = arith.subf %18, %17 : vector<64x1xf32>
    %20 = math.exp %19 : vector<64x1xf32>
    %cst_7 = arith.constant 1.000000e+00 : f32
    %21 = vector.broadcast %cst_7 : f32 to vector<64x1xf32>
    %22 = arith.subf %21, %20 : vector<64x1xf32>
    %23 = arith.mulf %22, %22 : vector<64x1xf32>
    %cst_8 = arith.constant 1.000000e+00 : f32
    %24 = vector.broadcast %cst_8 : f32 to vector<64x1xf32>
    %25 = arith.mulf %24, %23 : vector<64x1xf32>
    %26 = arith.mulf %25, %17 : vector<64x1xf32>
    %27 = tpu.iota {dimensions = array<i32: 0>} : vector<64x1xi32>
    %c64_i32 = arith.constant 64 : i32
    %28 = arith.muli %arg0, %c64_i32 : i32
    %29 = vector.broadcast %28 : i32 to vector<64x1xi32>
    %30 = arith.addi %27, %29 : vector<64x1xi32>
    %c200_i32 = arith.constant 200 : i32
    %31 = vector.broadcast %c200_i32 : i32 to vector<64x1xi32>
    %32 = arith.cmpi slt, %30, %31 : vector<64x1xi32>
    %cst_9 = arith.constant 0.000000e+00 : f32
    %33 = vector.broadcast %cst_9 : f32 to vector<64x1xf32>
    %34 = arith.select %32, %26, %33 : vector<64x1xi1>, vector<64x1xf32>
    %cst_10 = arith.constant dense<0.000000e+00> : vector<1xf32>
    %35 = vector.multi_reduction <add>, %34, %cst_10 [0] : vector<64x1xf32> to vector<1xf32>
    %36 = vector.shape_cast %35 : vector<1xf32> to vector<1x1xf32>
    %37 = tpu.iota {dimensions = array<i32: 1>} : vector<1x8x128xi32>
    %38 = tpu.iota {dimensions = array<i32: 2>} : vector<1x8x128xi32>
    %c0_i32 = arith.constant 0 : i32
    %39 = vector.broadcast %c0_i32 : i32 to vector<1x8x128xi32>
    %40 = arith.cmpi eq, %37, %39 : vector<1x8x128xi32>
    %c0_i32_11 = arith.constant 0 : i32
    %41 = vector.broadcast %c0_i32_11 : i32 to vector<1x8x128xi32>
    %42 = arith.cmpi eq, %38, %41 : vector<1x8x128xi32>
    %43 = arith.andi %40, %42 : vector<1x8x128xi1>
    %cst_12 = arith.constant 0.000000e+00 : f32
    %44 = vector.shape_cast %36 : vector<1x1xf32> to vector<1x1x1xf32>
    %45 = vector.broadcast %44 : vector<1x1x1xf32> to vector<1x8x128xf32>
    %46 = vector.broadcast %cst_12 : f32 to vector<1x8x128xf32>
    %47 = arith.select %43, %45, %46 : vector<1x8x128xi1>, vector<1x8x128xf32>
    %c0_13 = arith.constant 0 : index
    %c0_14 = arith.constant 0 : index
    %c0_15 = arith.constant 0 : index
    %48 = vector.load %arg3[%c0_13, %c0_14, %c0_15] : memref<1x8x128xf32, #tpu.memory_space<vmem>>, vector<1x8x128xf32>
    tpu.vector_store %arg3[%c0_13, %c0_14, %c0_15], %47 {strides = array<i32>} : memref<1x8x128xf32, #tpu.memory_space<vmem>>, vector<1x8x128xf32>,
    return
  }
  func.func @transform_0(%arg0: i32) -> (i32, i32) {
    %c0_i32 = arith.constant 0 : i32
    %c0_i32_0 = arith.constant 0 : i32
    return %arg0, %c0_i32 : i32, i32
  }
  func.func @transform_1(%arg0: i32) -> (i32, i32) {
    %c0_i32 = arith.constant 0 : i32
    %c0_i32_0 = arith.constant 0 : i32
    return %arg0, %c0_i32 : i32, i32
  }
  func.func @transform_2(%arg0: i32) -> (i32, i32, i32) {
    %c0_i32 = arith.constant 0 : i32
    %c0_i32_0 = arith.constant 0 : i32
    %c0_i32_1 = arith.constant 0 : i32
    return %arg0, %c0_i32, %c0_i32_0 : i32, i32, i32
  }
}

</mosaic_0001>

<bundles_post_ra>
// kernel: tpu_custom_call.1
= control target key start
LH: loop header
LB: loop body
LE: loop exit
PB: predicated region body
PF: predicated region fallthrough
CT: control target
= control target key end

     0   :  { %7 = vsyncpa [#allocation3], 0  ;;  %s881_s0 = inlined_call_operand.vmem [shape: f32[200,128], index: 0, kind: input, shape index: {}]   ;;  %s882_s1 = inlined_call_operand.vmem [shape: s32[200,1], index: 1, kind: input, shape index: {}]   ;;  %s883_s2 = inlined_call_operand.hbm [shape: f32[4,8,128], index: 2, kind: output, shape index: {}]  }
   0x1   :  { %9 = vsyncpa [#allocation3 + $0x1], 0  ;;  %s729_s9 = smov 0   ;;  %s731_s10 = smov 0  }
   0x2   :  { %s733_s11 = smov 0   ;;  %s735_s12 = smov 0  }
   0x3 LB: > { %s750_s13 = sadd.s32 4294967295, %s710_s12   ;;  %s546_s14 = sadd.s32 4294967294, %s710_s12   ;;  %s710_s12 = sphi %s735_s12, %s889_s12   ;;  %s706_s11 = sphi %s733_s11, %s888_s11   ;;  %s702_s10 = sphi %s731_s10, %s887_s10   ;;  %s698_s9 = sphi %s729_s9, %s886_s9  }
   0x4   : > { %s754_s15 = sadd.s32 1, %s710_s12   ;;  %s74_s16 = sadd.s32 1, %s706_s11 }
   0x5   : > { %s71_s17 = ssub.s32 %s710_s12, %s754_s15  ;;  %p84_p0 = scmp.ne.s32.totalorder %s706_s11, %s702_s10 }
   0x6   : > { %p72_p1 = scmp.eq.s32.totalorder %s71_s17, 0  ;;  %p85_p2 = scmp.eq.s32.totalorder %s750_s13, 3 }
   0x7   : > { %p90_p3 = scmp.ne.s32.totalorder %s702_s10, %s698_s9  ;;  %p91_p4 = scmp.eq.s32.totalorder %s546_s14, 3 }
   0x8   : > { %s765_s18 = scalar_select %p72_p1, %s706_s11, %s74_s16  }
   0x9   : > { %p767_p5 = por %p85_p2, %p84_p0  ;;  %p771_p6 = por %p91_p4, %p90_p3 }
   0xa   : > { %p549_p7 = scmp.ge.s32.totalorder %s710_s12, 1  ;;  %p143_p8 = scmp.lt.s32.totalorder %s710_s12, 5 }
   0xc   : > { %p144_p9 = pnand %p549_p7, %p143_p8 }
   0xd   : > { %s551_s21 = sshll.u32 (!%p144_p9), %s750_s13, 3  ;;  %s555_s29 = sshll.u32 (!%p144_p9), %s750_s13, 6 }
   0xe   : > { %147 = sbr.rel (%p144_p9) target bundleno = 407 (0x197), region = 28  ;;  %p183_p10 = scmp.lt.s32.totalorder (!%p144_p9), %s551_s21, 24 }
   0xf   : > { %s175_s30 = sand.u32 (!%p144_p9), 1, %s702_s10   ;;  %s557_s4 = sshll.u32 (!%p144_p9), %s750_s13, 7 }
  0x10   : > { %s550_s3 = sshll.u32 (!%p144_p9), %s175_s30, 3  ;;  %s846_s14 = scalar_lea.hbm (!%p144_p9), %s883_s2, %s557_s4 }
  0x11   : > { %s177_s5 = scalar_lea.vmem (!%p144_p9), [#allocation2], %s550_s3  ;;  %s462_s16 = scalar_lea.sflag (!%p144_p9), [#allocation3], %s175_s30 }
  0x12   : > { %s475_s6 = sshll.u32 (!%p144_p9), %s177_s5, 4  ;;  %s476_s6 = int_to_ptr.vmem [resolvable:$true] %s475_s6 }
  0x13   : > { %v712_v0 = vmov 0   ;;  %s891_s21 = smov (!%p183_p10, %s551_s21), 24  ;;  %v278_v46 = vlaneseq  ;;  %s650_s17 = scalar_lea.vmem %s476_s6, 128 }
  0x14   : > { %601 = vset.pattern.permute.xlu1 %v712_v0  ;;  %600 = vset.pattern.permute.xlu0 %v712_v0  ;;  %s552_s22 = sshll.u32 %s891_s21, 3  ;;  %p651_p11 = scmp.ne.s32.totalorder %s476_s6, %s650_s17 }
  0x15   : > { %s186_s25 = scalar_lea.vmem %s881_s0, %s552_s22  ;;  %s200_s28 = scalar_lea.vmem %s882_s1, %s552_s22  ;;  %v785_v50 = vand.u32 127, %v278_v46 }
  0x16   : > { %v208_v1 = vld [vmem:[%s186_s25 + $0x10] sm:$0xff]  ;;  %v206_v2 = vld [vmem:[%s186_s25] sm:$0xff]  ;;  %v209_v3 = vld [vmem:[%s186_s25 + $0x18] sm:$0xff]  ;;  %p652_p12 = pnand %p651_p11, %p767_p5  ;;  %s713_s21 = smov [#allocation2]  }
  0x17   : > { %226 = vmax.xlane.f32.xlu1 %v208_v1  ;;  %222 = vmax.xlane.f32.xlu0 %v206_v2  ;;  %v207_v4 = vld [vmem:[%s186_s25 + $0x8] sm:$0xff]  ;;  %v210_v6 = vld [vmem:[%s186_s25 + $0x20] sm:$0xff]  ;;  %v213_v7 = vld [vmem:[%s186_s25 + $0x38] sm:$0xff]  ;;  %s654_s13 = sshll.u32 %s713_s21, 4  ;;  %s655_s13 = int_to_ptr.vmem [resolvable:$false] %s654_s13 }
  0x18   : > { %v211_v5 = vld [vmem:[%s186_s25 + $0x28] sm:$0xff]  ;;  %v212_v8 = vld [vmem:[%s186_s25 + $0x30] sm:$0xff]  ;;  %v214_v11 = vld [vmem:[%s200_s28] sm:$0xff]  ;;  %p653_p13 = pneg %p652_p12  ;;  %s656_s22 = scalar_lea.vmem %s655_s13, 256 }
  0x19   : > { %v215_v9 = vld [vmem:[%s200_s28 + $0x8] sm:$0xff]  ;;  %v216_v10 = vld [vmem:[%s200_s28 + $0x10] sm:$0xff]  ;;  %v217_v12 = vld [vmem:[%s200_s28 + $0x18] sm:$0xff]  ;;  %p657_p0 = scmp.lt.s32.totalorder %s476_s6, %s655_s13  ;;  %p658_p1 = scmp.lt.s32.totalorder %s656_s22, %s650_s17 }
  0x1a   : > { %v218_v13 = vld [vmem:[%s200_s28 + $0x20] sm:$0xff]  ;;  %v219_v14 = vld [vmem:[%s200_s28 + $0x28] sm:$0xff]  ;;  %v220_v15 = vld [vmem:[%s200_s28 + $0x30] sm:$0xff] }
  0x1b   : > { %228 = vmax.xlane.f32.xlu1 %v209_v3  ;;  %224 = vmax.xlane.f32.xlu0 %v207_v4  ;;  %v221_v16 = vld [vmem:[%s200_s28 + $0x38] sm:$0xff]  ;;  %p659_p2 = por %p658_p1, %p657_p0 }
  0x1d   : > { %p660_p3 = pnand %p659_p2, %p653_p13 }
  0x1f   : > { %232 = vmax.xlane.f32.xlu1 %v211_v5  ;;  %230 = vmax.xlane.f32.xlu0 %v210_v6 }
  0x23   : > { %236 = vmax.xlane.f32.xlu1 %v213_v7  ;;  %234 = vmax.xlane.f32.xlu0 %v212_v8 }
  0x34   : > { %284 = vperm.xlu1 %601, %v215_v9  }
  0x38   : > { %287 = vperm.xlu1 %601, %v216_v10  }
  0x39   : > { %281 = vperm.xlu0 %600, %v214_v11  }
  0x3c   : > { %290 = vperm.xlu1 %601, %v217_v12  }
  0x40   : > { %293 = vperm.xlu1 %601, %v218_v13  }
  0x44   : > { %296 = vperm.xlu1 %601, %v219_v14  }
  0x48   : > { %299 = vperm.xlu1 %601, %v220_v15  }
  0x4c   : > { %302 = vperm.xlu1 %601, %v221_v16  }
  0xa0   : > { %v227_v17 = vpop.xlane.xlu1 %226  ;;  %v223_v18 = vpop.xlane.xlu0 %222 }
  0xa1   : > { %v238_v19 = vsub.f32 %v206_v2, %v223_v18  ;;  %v240_v25 = vsub.f32 %v208_v1, %v227_v17 }
  0xa3   : > { %v246_v20 = vmul.f32 1.442695, %v238_v19  ;;  %v250_v32 = vmul.f32 1.442695, %v240_v25 }
  0xa4   : > { %v229_v21 = vpop.xlane.xlu1 %228  ;;  %v225_v22 = vpop.xlane.xlu0 %224 }
  0xa5   : > { %v241_v23 = vsub.f32 %v209_v3, %v229_v21  ;;  %v239_v24 = vsub.f32 %v207_v4, %v225_v22  ;;  %602 = vpow2.f32 %v246_v20 }
  0xa7   : > { %v252_v26 = vmul.f32 1.442695, %v241_v23  ;;  %v248_v27 = vmul.f32 1.442695, %v239_v24 }
  0xa8   : > { %v233_v28 = vpop.xlane.xlu1 %232  ;;  %v231_v29 = vpop.xlane.xlu0 %230 }
  0xa9   : > { %604 = vpow2.f32 %v252_v26  ;;  %v243_v30 = vsub.f32 %v211_v5, %v233_v28  ;;  %v242_v31 = vsub.f32 %v210_v6, %v231_v29 }
  0xaa   : > { %606 = vpow2.f32 %v248_v27 }
  0xab   : > { %v256_v33 = vmul.f32 1.442695, %v243_v30  ;;  %v254_v35 = vmul.f32 1.442695, %v242_v31 }
  0xac   : > { %v237_v34 = vpop.xlane.xlu1 %236  ;;  %v235_v36 = vpop.xlane.xlu0 %234 }
  0xad   : > { %608 = vpow2.f32 %v256_v33  ;;  %v245_v37 = vsub.f32 %v213_v7, %v237_v34  ;;  %v244_v38 = vsub.f32 %v212_v8, %v235_v36 }
  0xae   : > { %610 = vpow2.f32 %v250_v32 }
  0xaf   : > { %v260_v39 = vmul.f32 1.442695, %v245_v37  ;;  %612 = vpow2.f32 %v254_v35  ;;  %v258_v41 = vmul.f32 1.442695, %v244_v38 }
  0xb0   : > { %v285_v40 = vpop.permute.xlu1 %284 }
  0xb1   : > { %614 = vpow2.f32 %v260_v39  ;;  %vm305_vm0 = vcmp.eq.s32.totalorder %v785_v50, %v285_v40 }
  0xb2   : > { %v603_v42 = vpop.eup %602  ;;  %616 = vpow2.f32 %v258_v41  ;;  %v313_v57 = vsel %vm305_vm0, %v239_v24, 0.0 }
  0xb3   : > { %262 = vadd.xlane.f32.xlu1 %v603_v42 }
  0xb4   : > { %v288_v43 = vpop.permute.xlu1 %287  ;;  %v282_v56 = vpop.permute.xlu0 %281 }
  0xb5   : > { %vm304_vm1 = vcmp.eq.s32.totalorder %v785_v50, %v282_v56  ;;  %vm306_vm3 = vcmp.eq.s32.totalorder %v785_v50, %v288_v43 }
  0xb6   : > { %v605_v44 = vpop.eup %604  ;;  %v312_v60 = vsel %vm304_vm1, %v238_v19, 0.0  ;;  %v314_v63 = vsel %vm306_vm3, %v240_v25, 0.0  ;;  %vm457_vm1 = vcmp.eq.s32.totalorder %v785_v50, 0 }
  0xb7   : > { %v607_v45 = vpop.eup %606  ;;  %268 = vadd.xlane.f32.xlu1 %v605_v44 }
  0xb8   : > { %264 = vadd.xlane.f32.xlu0 %v607_v45  ;;  %v291_v47 = vpop.permute.xlu1 %290 }
  0xb9   : > { %vm307_vm2 = vcmp.eq.s32.totalorder %v785_v50, %v291_v47 }
  0xba   : > { %v609_v48 = vpop.eup %608  ;;  %v315_v59 = vsel %vm307_vm2, %v241_v23, 0.0 }
  0xbb   : > { %v611_v49 = vpop.eup %610  ;;  %272 = vadd.xlane.f32.xlu1 %v609_v48 }
  0xbc   : > { %266 = vadd.xlane.f32.xlu0 %v611_v49  ;;  %v294_v51 = vpop.permute.xlu1 %293  ;;  %v613_v52 = vpop.eup %612 }
  0xbd   : > { %vm308_vm5 = vcmp.eq.s32.totalorder %v785_v50, %v294_v51 }
  0xbe   : > { %v615_v53 = vpop.eup %614  ;;  %v316_v1 = vsel %vm308_vm5, %v242_v31, 0.0 }
  0xbf   : > { %276 = vadd.xlane.f32.xlu1 %v615_v53  ;;  %v617_v55 = vpop.eup %616 }
  0xc0   : > { %270 = vadd.xlane.f32.xlu0 %v613_v52  ;;  %v297_v54 = vpop.permute.xlu1 %296 }
  0xc1   : > { %vm309_vm4 = vcmp.eq.s32.totalorder %v785_v50, %v297_v54  ;;  %v816_v54 = vshrl.u32 %v278_v46, 7 }
  0xc2   : > { %v317_v62 = vsel %vm309_vm4, %v243_v30, 0.0 }
  0xc3   : > { %322 = vadd.xlane.f32.xlu1 %v313_v57  ;;  %vm456_vm0 = vcmp.eq.s32.totalorder %v816_v54, 0 }
  0xc4   : > { %274 = vadd.xlane.f32.xlu0 %v617_v55  ;;  %v300_v58 = vpop.permute.xlu1 %299  ;;  %vm458_vm2 = vmand %vm456_vm0, %vm457_vm1 }
  0xc5   : > { %vm310_vm7 = vcmp.eq.s32.totalorder %v785_v50, %v300_v58 }
  0xc6   : > { %v318_v2 = vsel %vm310_vm7, %v244_v38, 0.0 }
  0xc7   : > { %326 = vadd.xlane.f32.xlu1 %v315_v59 }
  0xc8   : > { %320 = vadd.xlane.f32.xlu0 %v312_v60  ;;  %v303_v61 = vpop.permute.xlu1 %302 }
  0xc9   : > { %vm311_vm6 = vcmp.eq.s32.totalorder %v785_v50, %v303_v61  ;;  %v410_v61 = vadd.s32 8, %v816_v54 }
  0xca   : > { %v319_v0 = vsel %vm311_vm6, %v245_v37, 0.0 }
  0xcb   : > { %330 = vadd.xlane.f32.xlu1 %v317_v62  ;;  %v418_v62 = vstv %s555_s29 }
  0xcc   : > { %324 = vadd.xlane.f32.xlu0 %v314_v63 }
  0xcf   : > { %334 = vadd.xlane.f32.xlu1 %v319_v0  ;;  %v420_v0 = vadd.s32 %v418_v62, %v410_v61 }
  0xd0   : > { %328 = vadd.xlane.f32.xlu0 %v316_v1 }
  0xd1   : > { %vm428_vm8 = vcmp.lt.s32.totalorder %v420_v0, 200 }
  0xd4   : > { %332 = vadd.xlane.f32.xlu0 %v318_v2 }
 0x13c   : > { %v263_v3 = vpop.xlane.xlu1 %262 }
 0x13d   : > { %618 = vlog2.f32 %v263_v3  ;;  %v411_v3 = vadd.s32 16, %v816_v54 }
 0x140   : > { %v269_v4 = vpop.xlane.xlu1 %268 }
 0x141   : > { %v265_v5 = vpop.xlane.xlu0 %264  ;;  %620 = vlog2.f32 %v269_v4 }
 0x142   : > { %622 = vlog2.f32 %v265_v5 }
 0x144   : > { %v273_v6 = vpop.xlane.xlu1 %272 }
 0x145   : > { %v267_v7 = vpop.xlane.xlu0 %266  ;;  %624 = vlog2.f32 %v273_v6  ;;  %v419_v6 = vadd.s32 %v418_v62, %v816_v54 }
 0x146   : > { %626 = vlog2.f32 %v267_v7  ;;  %v412_v7 = vadd.s32 24, %v816_v54 }
 0x147   : > { %vm427_vm9 = vcmp.lt.s32.totalorder %v419_v6, 200 }
 0x148   : > { %v277_v8 = vpop.xlane.xlu1 %276 }
 0x149   : > { %v271_v9 = vpop.xlane.xlu0 %270  ;;  %628 = vlog2.f32 %v277_v8 }
 0x14a   : > { %630 = vlog2.f32 %v271_v9  ;;  %v619_v10 = vpop.eup %618 }
 0x14b   : > { %v337_v16 = vmul.f32 0.6931472, %v619_v10 }
 0x14c   : > { %v323_v11 = vpop.xlane.xlu1 %322 }
 0x14d   : > { %v275_v12 = vpop.xlane.xlu0 %274 }
 0x14e   : > { %632 = vlog2.f32 %v275_v12  ;;  %v621_v13 = vpop.eup %620 }
 0x14f   : > { %v623_v14 = vpop.eup %622  ;;  %v343_v15 = vmul.f32 0.6931472, %v621_v13 }
 0x150   : > { %v339_v17 = vmul.f32 0.6931472, %v623_v14  ;;  %v327_v18 = vpop.xlane.xlu1 %326  ;;  %v421_v14 = vadd.s32 %v418_v62, %v411_v3 }
 0x151   : > { %v321_v19 = vpop.xlane.xlu0 %320  ;;  %v795_v20 = vsub.f32 %v343_v15, %v327_v18  ;;  %v413_v15 = vadd.s32 32, %v816_v54 }
 0x152   : > { %v797_v21 = vsub.f32 %v337_v16, %v321_v19  ;;  %v625_v22 = vpop.eup %624  ;;  %v799_v23 = vsub.f32 %v339_v17, %v323_v11  ;;  %v422_v19 = vadd.s32 %v418_v62, %v412_v7  ;;  %vm429_vm10 = vcmp.lt.s32.totalorder %v421_v14, 200 }
 0x153   : > { %v627_v24 = vpop.eup %626  ;;  %v363_v25 = vsub.f32 0.0, %v795_v20  ;;  %v347_v27 = vmul.f32 0.6931472, %v625_v22 }
 0x154   : > { %v360_v26 = vsub.f32 0.0, %v797_v21  ;;  %v361_v28 = vsub.f32 0.0, %v799_v23  ;;  %v331_v29 = vpop.xlane.xlu1 %330  ;;  %v341_v30 = vmul.f32 0.6931472, %v627_v24  ;;  %v414_v24 = vadd.s32 40, %v816_v54 }
 0x155   : > { %v325_v31 = vpop.xlane.xlu0 %324  ;;  %v374_v32 = vmul.f32 1.442695, %v363_v25  ;;  %v804_v34 = vsub.f32 %v347_v27, %v331_v29  ;;  %vm430_vm11 = vcmp.lt.s32.totalorder %v422_v19, 200 }
 0x156   : > { %v368_v33 = vmul.f32 1.442695, %v360_v26  ;;  %v629_v35 = vpop.eup %628  ;;  %v370_v36 = vmul.f32 1.442695, %v361_v28  ;;  %v806_v37 = vsub.f32 %v341_v30, %v325_v31  ;;  %v415_v28 = vadd.s32 48, %v816_v54 }
 0x157   : > { %v631_v38 = vpop.eup %630  ;;  %634 = vpow2.f32 %v374_v32  ;;  %v365_v39 = vsub.f32 0.0, %v804_v34  ;;  %v351_v40 = vmul.f32 0.6931472, %v629_v35  ;;  %v423_v32 = vadd.s32 %v418_v62, %v413_v15 }
 0x158   : > { %636 = vpow2.f32 %v370_v36  ;;  %v362_v41 = vsub.f32 0.0, %v806_v37  ;;  %v335_v42 = vpop.xlane.xlu1 %334  ;;  %v345_v43 = vmul.f32 0.6931472, %v631_v38  ;;  %v424_v38 = vadd.s32 %v418_v62, %v414_v24 }
 0x159   : > { %v329_v44 = vpop.xlane.xlu0 %328  ;;  %638 = vpow2.f32 %v368_v33  ;;  %v378_v45 = vmul.f32 1.442695, %v365_v39  ;;  %v810_v47 = vsub.f32 %v351_v40, %v335_v42  ;;  %v416_v39 = vadd.s32 56, %v816_v54 }
 0x15a   : > { %v372_v49 = vmul.f32 1.442695, %v362_v41  ;;  %v812_v51 = vsub.f32 %v345_v43, %v329_v44  ;;  %v425_v43 = vadd.s32 %v418_v62, %v415_v28  ;;  %vm431_vm12 = vcmp.lt.s32.totalorder %v423_v32, 200 }
 0x15b   : > { %v633_v48 = vpop.eup %632  ;;  %640 = vpow2.f32 %v378_v45  ;;  %v367_v52 = vsub.f32 0.0, %v810_v47  ;;  %vm432_vm13 = vcmp.lt.s32.totalorder %v424_v38, 200 }
 0x15c   : > { %v349_v53 = vmul.f32 0.6931472, %v633_v48  ;;  %642 = vpow2.f32 %v372_v49  ;;  %v364_v55 = vsub.f32 0.0, %v812_v51  ;;  %vm433_vm14 = vcmp.lt.s32.totalorder %v425_v43, 200 }
 0x15d   : > { %v333_v56 = vpop.xlane.xlu0 %332  ;;  %v382_v57 = vmul.f32 1.442695, %v367_v52  ;;  %v426_v52 = vadd.s32 %v418_v62, %v416_v39 }
 0x15e   : > { %v819_v58 = vsub.f32 %v349_v53, %v333_v56  ;;  %v376_v59 = vmul.f32 1.442695, %v364_v55 }
 0x15f   : > { %644 = vpow2.f32 %v382_v57  ;;  %vm434_vm15 = vcmp.lt.s32.totalorder %v426_v52, 200 }
 0x160   : > { %v366_v60 = vsub.f32 0.0, %v819_v58  ;;  %646 = vpow2.f32 %v376_v59 }
 0x162   : > { %v380_v63 = vmul.f32 1.442695, %v366_v60 }
 0x164   : > { %648 = vpow2.f32 %v380_v63  ;;  %v635_v46 = vpop.eup %634 }
 0x165   : > { %v637_v1 = vpop.eup %636  ;;  %v387_v2 = vsub.f32 1.0, %v635_v46 }
 0x166   : > { %v639_v4 = vpop.eup %638  ;;  %v385_v5 = vsub.f32 1.0, %v637_v1 }
 0x167   : > { %v384_v8 = vsub.f32 1.0, %v639_v4  ;;  %v395_v12 = vmul.f32 %v387_v2, %v387_v2 }
 0x168   : > { %v641_v9 = vpop.eup %640  ;;  %v393_v10 = vmul.f32 %v385_v5, %v385_v5 }
 0x169   : > { %v643_v11 = vpop.eup %642  ;;  %v392_v13 = vmul.f32 %v384_v8, %v384_v8  ;;  %v389_v17 = vsub.f32 1.0, %v641_v9  ;;  %v403_v30 = vmul.f32 %v395_v12, %v795_v20 }
 0x16a   : > { %v401_v16 = vmul.f32 %v393_v10, %v799_v23  ;;  %v386_v18 = vsub.f32 1.0, %v643_v11 }
 0x16b   : > { %v400_v22 = vmul.f32 %v392_v13, %v797_v21  ;;  %v397_v23 = vmul.f32 %v389_v17, %v389_v17  ;;  %v438_v45 = vsel %vm430_vm11, %v403_v30, 0.0 }
 0x16c   : > { %v645_v25 = vpop.eup %644  ;;  %v436_v26 = vsel %vm428_vm8, %v401_v16, 0.0  ;;  %v394_v27 = vmul.f32 %v386_v18, %v386_v18 }
 0x16d   : > { %v647_v29 = vpop.eup %646  ;;  %v435_v31 = vsel %vm427_vm9, %v400_v22, 0.0  ;;  %v391_v35 = vsub.f32 1.0, %v645_v25  ;;  %v405_v48 = vmul.f32 %v397_v23, %v804_v34 }
 0x16e   : > { %v402_v33 = vmul.f32 %v394_v27, %v806_v37  ;;  %v388_v36 = vsub.f32 1.0, %v647_v29  ;;  %v443_v21 = vadd.f32 %v436_v26, %v435_v31 }
 0x16f   : > { %v399_v49 = vmul.f32 %v391_v35, %v391_v35  ;;  %v440_v60 = vsel %vm432_vm13, %v405_v48, 0.0 }
 0x170   : > { %v437_v41 = vsel %vm429_vm10, %v402_v33, 0.0  ;;  %v396_v42 = vmul.f32 %v388_v36, %v388_v36 }
 0x171   : > { %v649_v40 = vpop.eup %648  ;;  %v444_v44 = vadd.f32 %v443_v21, %v437_v41  ;;  %v407_v61 = vmul.f32 %v399_v49, %v810_v47 }
 0x172   : > { %v390_v20 = vsub.f32 1.0, %v649_v40  ;;  %v404_v37 = vmul.f32 %v396_v42, %v812_v51 }
 0x173   : > { %v445_v53 = vadd.f32 %v444_v44, %v438_v45  ;;  %v442_v0 = vsel %vm434_vm15, %v407_v61, 0.0 }
 0x174   : > { %v398_v55 = vmul.f32 %v390_v20, %v390_v20  ;;  %v439_v56 = vsel %vm431_vm12, %v404_v37, 0.0 }
 0x175   : > { %v446_v57 = vadd.f32 %v445_v53, %v439_v56 }
 0x176   : > { %v406_v59 = vmul.f32 %v398_v55, %v819_v58 }
 0x177   : > { %v447_v63 = vadd.f32 %v446_v57, %v440_v60 }
 0x178   : > { %v441_v34 = vsel %vm433_vm14, %v406_v59, 0.0 }
 0x179   : > { %v448_v46 = vadd.f32 %v447_v63, %v441_v34 }
 0x17b   : > { %v449_v51 = vadd.f32 %v448_v46, %v442_v0 }
 0x17d   : > { %v450_v1 = vrot.slane %v449_v51, 4 }
 0x17f   : > { %v451_v62 = vadd.f32 %v450_v1, %v449_v51 }
 0x181   : > { %v452_v2 = vrot.slane %v451_v62, 2 }
 0x183   : > { %v453_v3 = vadd.f32 %v452_v2, %v451_v62 }
 0x185   : > { %v454_v58 = vrot.slane %v453_v3, 1 }
 0x187   : > { %v455_v47 = vadd.f32 %v454_v58, %v453_v3 }
 0x189   : > { %v459_v4 = vsel %vm458_vm2, %v455_v47, 0.0 }
 0x18a   : > { %460 = vst [vmem:[%s177_s5] sm:$0xff] %v459_v4 }
 0x18b   : > { %663 = shalt.err (!%p660_p3)
}
 0x18c   : > { %s664_s23 = scalar_lea.hbm %s846_s14, 128  ;;  %s668_s26 = scalar_lea.hbm %s883_s2, 512 }
 0x18d   : > { %p665_p4 = scmp.ne.s32.totalorder %s846_s14, %s664_s23  ;;  %p669_p9 = scmp.lt.s32.totalorder %s846_s14, %s883_s2 }
 0x18e   : > { %p670_p10 = scmp.lt.s32.totalorder %s668_s26, %s664_s23 }
 0x18f   : > { %p666_p7 = pnand %p665_p4, %p767_p5 }
 0x190   : > { %p671_p11 = por %p670_p10, %p669_p9 }
 0x191   : > { %p667_p8 = pneg %p666_p7 }
 0x193   : > { %p672_p12 = pnand %p671_p11, %p667_p8 }
 0x195   : > { %675 = shalt.err (!%p672_p12)
}
 0x196   : > { %560 = dma.vmem_to_hbm [thread:$0]  (%p767_p5), %s476_s6, 128, %s846_s14, %s462_s16  }
 0x197 PF: > { %p566_p13 = scmp.ge.s32.totalorder %s710_s12, 2  ;;  %s487_s29 = sand.u32 1, %s698_s9  }
 0x198   : > { %s488_s30 = scalar_lea.sflag [#allocation3], %s487_s29 }
 0x199   : > { %p563_p0 = pnand %p566_p13, %p771_p6 }
 0x19b   : > { %p564_p1 = pneg %p563_p0 }
 0x19d   : > { %693 = dma.done.wait (%p564_p1), %s488_s30, 128  }
 0x19e   : > { %695 = vsyncadd (%p564_p1), %s488_s30, 4294967168  ;;  %p12_p2 = scmp.ge.s32.totalorder %s754_s15, 6   ;;  %s886_s9 = smov %s702_s10 }
 0x19f   : > { %s887_s10 = smov %s706_s11  ;;  %s888_s11 = smov %s765_s18 }
 0x1a0   : > { %s889_s12 = smov %s754_s15  ;;  %14 = sbr.rel (!%p12_p2) target bundleno = 3 (0x3), region = 66 }
 0x1a5   :  { %493 = vsyncpa [#allocation3], 1 }
 0x1a6   :  { %495 = vsyncpa [#allocation3 + $0x1], 1 }

</bundles_post_ra>
